<compile_context>
chip_gen: v5e
topology: v5e:2x2
jax: 0.10.0
libtpu: 0.0.40
codegen_flags: <defaults>
</compile_context>

<pallas_src>
import functools

import jax
import jax.numpy as jnp
from jax.experimental import pallas as pl
from jax.experimental.pallas import tpu as pltpu


_LANE = 128          # lane width: feature dims padded to multiples of this
_SUBLANE = 8         # sublane width: batch tiles are multiples of this
_TARGET_BLOCK_B = 512   # ~85% of HBM roofline at 512+ row tiles
_MIN_SPLIT_TILE = 256   # only split a batch across v7x's 2 TCs above 2*this

_ACT_NAMES = {0: "relu", 1: "sigmoid", 2: "tanh", 3: "leaky_relu"}


def _round_up(x, m):
    return ((x + m - 1) // m) * m


def _apply_act(y, act):
    if act == "relu":
        return jnp.maximum(y, 0.0)
    if act == "sigmoid":
        return jax.nn.sigmoid(y)
    if act == "tanh":
        return jnp.tanh(y)
    if act == "leaky_relu":
        return jnp.where(y >= 0, y, 0.01 * y)   # PyTorch default slope
    raise ValueError(f"unknown activation {act!r}")


# -----------------------------------------------------------------------------
# Fused MLP kernel: all layers chained in one body, activations stay in VMEM.
# -----------------------------------------------------------------------------
def _fused_mlp_kernel(x_ref, *refs, act, num_hidden):
    """refs = (w0, b0, w1, b1, ..., w_out, b_out, o_ref).

    Weights are (In[_p], Out_p) bf16 -- already transposed + zero-padded.
    Biases are (1, Out_p) f32.
    """
    o_ref = refs[-1]
    wb = refs[:-1]

    h = x_ref[...]                                           # (BB, in_f) f32
    for i in range(num_hidden):
        w = wb[2 * i][...]
        b = wb[2 * i + 1][...]
        # bf16 MXU operands, f32 accumulate; elementwise stays f32 (v5e-safe).
        h = jnp.dot(h.astype(w.dtype), w,
                    preferred_element_type=jnp.float32) + b
        h = _apply_act(h, act)
        # dropout: identity at inference

    w_out = wb[-2][...]
    b_out = wb[-1][...]
    h = jnp.dot(h.astype(w_out.dtype), w_out,
                preferred_element_type=jnp.float32) + b_out
    h = jnp.maximum(h, 0.0) + 0.5                            # F.relu(x) + 0.5
    o_ref[...] = h.astype(o_ref.dtype)


# -----------------------------------------------------------------------------
# One-time parameter prep: transpose + pad + bf16 cast (hoisted off hot path)
# -----------------------------------------------------------------------------
def prepare_params(params, mxu_dtype=jnp.bfloat16):
    """params: [(W (Out,In), b (Out,)), ...] -> [(W_T padded bf16, b padded f32), ...]."""
    prepped = []
    for li, (w, b) in enumerate(params):
        out_f, in_f = w.shape
        # First layer keeps its true input width so x needs no feature padding
        # (zero-copy input).  Later layers zero-pad the input rows up to the
        # previous layer's 128-padded output width so padded activation lanes
        # never contaminate the next layer.
        in_p = in_f if li == 0 else _round_up(in_f, _LANE)
        out_p = _round_up(out_f, _LANE)
        wt = jnp.zeros((in_p, out_p), jnp.float32).at[:in_f, :out_f].set(w.T)
        wt = wt.astype(mxu_dtype)
        bp = jnp.zeros((1, out_p), jnp.float32).at[:, :out_f].set(b)
        prepped.append((wt, bp))
    return prepped


def _pick_block_b(batch):
    pad_b = _round_up(batch, _SUBLANE)
    if pad_b > _TARGET_BLOCK_B:
        return _TARGET_BLOCK_B                       # grid >= 2 automatically
    if pad_b >= 2 * _MIN_SPLIT_TILE:
        # Big enough that splitting in two keeps both v7x TCs busy.
        return _round_up(pl.cdiv(pad_b, 2), _SUBLANE)
    return pad_b


def _vmem_limit_bytes(block_b, in_f, out_p, prepped, weight_bufs):
    est = 2 * block_b * in_f * 4          # x block, double-buffered
    est += 2 * block_b * out_p * 4        # output block, double-buffered
    widest = out_p
    for wt, bp in prepped:
        est += weight_bufs * wt.size * wt.dtype.itemsize
        est += 2 * _SUBLANE * bp.shape[1] * 4     # sublane-padded bias blocks
        widest = max(widest, wt.shape[1])
    est += 3 * block_b * widest * 4       # live f32/bf16 intermediates
    # Generous margin; clamp to v7x-safe 64 MiB, floor at 16 MiB.
    return int(min(max(2 * est + (4 << 20), 16 << 20), 64 << 20))


def _forward_impl(x, prepped_params, activation, output_size,
                  single_buffer_weights):
    act = _ACT_NAMES[activation]
    num_hidden = len(prepped_params) - 1

    B, in_f = x.shape
    assert in_f == prepped_params[0][0].shape[0]
    out_p = prepped_params[-1][0].shape[1]

    block_b = _pick_block_b(B)
    grid = (pl.cdiv(B, block_b),)

    wb_kwargs = {}
    if single_buffer_weights:
        # Grid-invariant blocks: one resident buffer is enough.
        wb_kwargs["pipeline_mode"] = pl.Buffered(1)

    in_specs = [pl.BlockSpec((block_b, in_f), lambda i: (i, 0))]
    flat_args = []
    for wt, bp in prepped_params:
        in_specs.append(pl.BlockSpec(wt.shape, lambda i: (0, 0), **wb_kwargs))
        in_specs.append(pl.BlockSpec(bp.shape, lambda i: (0, 0), **wb_kwargs))
        flat_args += [wt, bp]

    weight_bufs = 1 if single_buffer_weights else 2
    vmem_limit = _vmem_limit_bytes(block_b, in_f, out_p, prepped_params,
                                   weight_bufs)

    kernel = functools.partial(_fused_mlp_kernel, act=act,
                               num_hidden=num_hidden)
    out_padded = pl.pallas_call(
        kernel,
        grid=grid,
        out_shape=jax.ShapeDtypeStruct((B, out_p), jnp.float32),
        in_specs=in_specs,
        out_specs=pl.BlockSpec((block_b, out_p), lambda i: (i, 0)),
        compiler_params=pltpu.CompilerParams(
            dimension_semantics=("parallel",),
            vmem_limit_bytes=vmem_limit),
    )(x, *flat_args)

    return out_padded[:, :output_size]


def fused_mlp_forward(x, prepped_params, activation, output_size):
    """x: (B, input_size) f32. prepped_params from prepare_params()."""
    try:
        return _forward_impl(x, prepped_params, activation, output_size,
                             single_buffer_weights=True)
    except Exception:
        # pl.Buffered(1) weight residency rejected by this jax build; fall back
        # to default double-buffered weights (correctness identical).
        return _forward_impl(x, prepped_params, activation, output_size,
                             single_buffer_weights=False)


# -----------------------------------------------------------------------------
# Parameter init matching the PyTorch module
# -----------------------------------------------------------------------------
def init_feedforward_params(key, input_size, lin_layer_sizes, output_size):
    """Weights ~ kaiming_normal_ (std = sqrt(2/fan_in)),
    biases ~ U(-1/sqrt(fan_in), 1/sqrt(fan_in)) (nn.Linear default)."""
    params = []
    sizes = [input_size] + list(lin_layer_sizes) + [output_size]
    for fan_in, fan_out in zip(sizes[:-1], sizes[1:]):
        key, kw, kb = jax.random.split(key, 3)
        std = (2.0 / fan_in) ** 0.5
        w = std * jax.random.normal(kw, (fan_out, fan_in), dtype=jnp.float32)
        bound = 1.0 / (fan_in ** 0.5)
        b = jax.random.uniform(kb, (fan_out,), minval=-bound, maxval=bound,
                               dtype=jnp.float32)
        params.append((w, b))
    return params


# -----------------------------------------------------------------------------
# Main
# -----------------------------------------------------------------------------
if __name__ == "__main__":
    batch = 8
    input_size = 32
    lin_layer_sizes = [64, 32]
    output_size = 16
    lin_layer_dropouts = [0.1, 0.2]      # identity at inference
    activation = 0                       # ReLU

    key = jax.random.PRNGKey(0)
    key, kx = jax.random.split(key)
    x = jax.random.normal(kx, (batch, input_size), dtype=jnp.float32)

    params = init_feedforward_params(key, input_size, lin_layer_sizes,
                                     output_size)
    prepped = prepare_params(params)     # one-time: transpose + pad + bf16

    out = jax.block_until_ready(
        fused_mlp_forward(x, prepped, activation, output_size))

    # Pure-JAX f32 reference (unpadded, layer-by-layer).
    def reference(x, params, act_name):
        h = x
        for w, b in params[:-1]:
            h = _apply_act(h @ w.T + b, act_name)
        w_o, b_o = params[-1]
        return jnp.maximum(h @ w_o.T + b_o, 0.0) + 0.5

    ref = reference(x, params, "relu")
    assert out.shape == (batch, output_size)
    # bf16 MXU operands (f32 accumulate) vs f32 reference -> loosened tolerance.
    assert jnp.allclose(out, ref, atol=5e-2, rtol=5e-2)

    # Second check with sigmoid (non-zero at 0) to exercise the
    # zero-padded-weight isolation of padded activation lanes.
    out_sig = jax.block_until_ready(
        fused_mlp_forward(x, prepped, 1, output_size))
    ref_sig = reference(x, params, "sigmoid")
    assert jnp.allclose(out_sig, ref_sig, atol=5e-2, rtol=5e-2)

    print("KERNEL_OK")
</pallas_src>

<mosaic_0001>
module attributes {stable_mosaic.version = 11 : i64} {
  func.func @_fused_mlp_kernel(%arg0: i32, %arg1: memref<8x32xf32, #tpu.memory_space<vmem>>, %arg2: memref<32x128xbf16, #tpu.memory_space<vmem>>, %arg3: memref<1x128xf32, #tpu.memory_space<vmem>>, %arg4: memref<128x128xbf16, #tpu.memory_space<vmem>>, %arg5: memref<1x128xf32, #tpu.memory_space<vmem>>, %arg6: memref<128x128xbf16, #tpu.memory_space<vmem>>, %arg7: memref<1x128xf32, #tpu.memory_space<vmem>>, %arg8: memref<8x128xf32, #tpu.memory_space<vmem>>) attributes {dimension_semantics = [#tpu.dimension_semantics<parallel>], iteration_bounds = array<i64: 1>, scalar_prefetch = 0 : i64, scratch_operands = 0 : i64, tpu.core_type = #tpu.core_type<tc>, window_params = [{transform_indices = @transform_0, window_bounds = array<i64: 8, 32>}, {pipeline_mode = #tpu.pipeline_mode<synchronous>, transform_indices = @transform_1, window_bounds = array<i64: 32, 128>}, {pipeline_mode = #tpu.pipeline_mode<synchronous>, transform_indices = @transform_2, window_bounds = array<i64: 1, 128>}, {pipeline_mode = #tpu.pipeline_mode<synchronous>, transform_indices = @transform_3, window_bounds = array<i64: 128, 128>}, {pipeline_mode = #tpu.pipeline_mode<synchronous>, transform_indices = @transform_4, window_bounds = array<i64: 1, 128>}, {pipeline_mode = #tpu.pipeline_mode<synchronous>, transform_indices = @transform_5, window_bounds = array<i64: 128, 128>}, {pipeline_mode = #tpu.pipeline_mode<synchronous>, transform_indices = @transform_6, window_bounds = array<i64: 1, 128>}, {transform_indices = @transform_7, window_bounds = array<i64: 8, 128>}]} {
    %c0 = arith.constant 0 : index
    %c0_0 = arith.constant 0 : index
    %0 = vector.load %arg1[%c0, %c0_0] : memref<8x32xf32, #tpu.memory_space<vmem>>, vector<8x32xf32>
    %c0_1 = arith.constant 0 : index
    %c0_2 = arith.constant 0 : index
    %1 = vector.load %arg2[%c0_1, %c0_2] : memref<32x128xbf16, #tpu.memory_space<vmem>>, vector<32x128xbf16>
    %c0_3 = arith.constant 0 : index
    %c0_4 = arith.constant 0 : index
    %2 = vector.load %arg3[%c0_3, %c0_4] : memref<1x128xf32, #tpu.memory_space<vmem>>, vector<1x128xf32>
    %3 = arith.truncf %0 : vector<8x32xf32> to vector<8x32xbf16>
    %cst = arith.constant dense<0.000000e+00> : vector<8x128xf32>
    %4 = tpu.matmul %3, %1, %cst {dimension_numbers = #tpu.dot_dimension_numbers<[1], [0], [0], [1], [0, 0, 1, 1], [], []>} : vector<8x32xbf16>, vector<32x128xbf16>, vector<8x128xf32> -> vector<8x128xf32>
    %5 = vector.broadcast %2 : vector<1x128xf32> to vector<8x128xf32>
    %6 = arith.addf %4, %5 : vector<8x128xf32>
    %cst_5 = arith.constant 0.000000e+00 : f32
    %7 = vector.broadcast %cst_5 : f32 to vector<8x128xf32>
    %8 = arith.maximumf %6, %7 : vector<8x128xf32>
    %c0_6 = arith.constant 0 : index
    %c0_7 = arith.constant 0 : index
    %9 = vector.load %arg4[%c0_6, %c0_7] : memref<128x128xbf16, #tpu.memory_space<vmem>>, vector<128x128xbf16>
    %c0_8 = arith.constant 0 : index
    %c0_9 = arith.constant 0 : index
    %10 = vector.load %arg5[%c0_8, %c0_9] : memref<1x128xf32, #tpu.memory_space<vmem>>, vector<1x128xf32>
    %11 = arith.truncf %8 : vector<8x128xf32> to vector<8x128xbf16>
    %cst_10 = arith.constant dense<0.000000e+00> : vector<8x128xf32>
    %12 = tpu.matmul %11, %9, %cst_10 {dimension_numbers = #tpu.dot_dimension_numbers<[1], [0], [0], [1], [0, 0, 1, 1], [], []>} : vector<8x128xbf16>, vector<128x128xbf16>, vector<8x128xf32> -> vector<8x128xf32>
    %13 = vector.broadcast %10 : vector<1x128xf32> to vector<8x128xf32>
    %14 = arith.addf %12, %13 : vector<8x128xf32>
    %cst_11 = arith.constant 0.000000e+00 : f32
    %15 = vector.broadcast %cst_11 : f32 to vector<8x128xf32>
    %16 = arith.maximumf %14, %15 : vector<8x128xf32>
    %c0_12 = arith.constant 0 : index
    %c0_13 = arith.constant 0 : index
    %17 = vector.load %arg6[%c0_12, %c0_13] : memref<128x128xbf16, #tpu.memory_space<vmem>>, vector<128x128xbf16>
    %c0_14 = arith.constant 0 : index
    %c0_15 = arith.constant 0 : index
    %18 = vector.load %arg7[%c0_14, %c0_15] : memref<1x128xf32, #tpu.memory_space<vmem>>, vector<1x128xf32>
    %19 = arith.truncf %16 : vector<8x128xf32> to vector<8x128xbf16>
    %cst_16 = arith.constant dense<0.000000e+00> : vector<8x128xf32>
    %20 = tpu.matmul %19, %17, %cst_16 {dimension_numbers = #tpu.dot_dimension_numbers<[1], [0], [0], [1], [0, 0, 1, 1], [], []>} : vector<8x128xbf16>, vector<128x128xbf16>, vector<8x128xf32> -> vector<8x128xf32>
    %21 = vector.broadcast %18 : vector<1x128xf32> to vector<8x128xf32>
    %22 = arith.addf %20, %21 : vector<8x128xf32>
    %cst_17 = arith.constant 0.000000e+00 : f32
    %23 = vector.broadcast %cst_17 : f32 to vector<8x128xf32>
    %24 = arith.maximumf %22, %23 : vector<8x128xf32>
    %cst_18 = arith.constant 5.000000e-01 : f32
    %25 = vector.broadcast %cst_18 : f32 to vector<8x128xf32>
    %26 = arith.addf %24, %25 : vector<8x128xf32>
    %c0_19 = arith.constant 0 : index
    %c0_20 = arith.constant 0 : index
    %27 = vector.load %arg8[%c0_19, %c0_20] : memref<8x128xf32, #tpu.memory_space<vmem>>, vector<8x128xf32>
    tpu.vector_store %arg8[%c0_19, %c0_20], %26 {strides = array<i32>} : memref<8x128xf32, #tpu.memory_space<vmem>>, vector<8x128xf32>,
    return
  }
  func.func @transform_0(%arg0: i32) -> (i32, i32) {
    %c0_i32 = arith.constant 0 : i32
    %c0_i32_0 = arith.constant 0 : i32
    return %arg0, %c0_i32 : i32, i32
  }
  func.func @transform_1(%arg0: i32) -> (i32, i32) {
    %c0_i32 = arith.constant 0 : i32
    %c0_i32_0 = arith.constant 0 : i32
    %c0_i32_1 = arith.constant 0 : i32
    return %c0_i32, %c0_i32_0 : i32, i32
  }
  func.func @transform_2(%arg0: i32) -> (i32, i32) {
    %c0_i32 = arith.constant 0 : i32
    %c0_i32_0 = arith.constant 0 : i32
    %c0_i32_1 = arith.constant 0 : i32
    return %c0_i32, %c0_i32_0 : i32, i32
  }
  func.func @transform_3(%arg0: i32) -> (i32, i32) {
    %c0_i32 = arith.constant 0 : i32
    %c0_i32_0 = arith.constant 0 : i32
    %c0_i32_1 = arith.constant 0 : i32
    return %c0_i32, %c0_i32_0 : i32, i32
  }
  func.func @transform_4(%arg0: i32) -> (i32, i32) {
    %c0_i32 = arith.constant 0 : i32
    %c0_i32_0 = arith.constant 0 : i32
    %c0_i32_1 = arith.constant 0 : i32
    return %c0_i32, %c0_i32_0 : i32, i32
  }
  func.func @transform_5(%arg0: i32) -> (i32, i32) {
    %c0_i32 = arith.constant 0 : i32
    %c0_i32_0 = arith.constant 0 : i32
    %c0_i32_1 = arith.constant 0 : i32
    return %c0_i32, %c0_i32_0 : i32, i32
  }
  func.func @transform_6(%arg0: i32) -> (i32, i32) {
    %c0_i32 = arith.constant 0 : i32
    %c0_i32_0 = arith.constant 0 : i32
    %c0_i32_1 = arith.constant 0 : i32
    return %c0_i32, %c0_i32_0 : i32, i32
  }
  func.func @transform_7(%arg0: i32) -> (i32, i32) {
    %c0_i32 = arith.constant 0 : i32
    %c0_i32_0 = arith.constant 0 : i32
    return %arg0, %c0_i32 : i32, i32
  }
}

module attributes {stable_mosaic.version = 11 : i64} {
  func.func @_fused_mlp_kernel(%arg0: i32, %arg1: memref<8x32xf32, #tpu.memory_space<vmem>>, %arg2: memref<32x128xbf16, #tpu.memory_space<vmem>>, %arg3: memref<1x128xf32, #tpu.memory_space<vmem>>, %arg4: memref<128x128xbf16, #tpu.memory_space<vmem>>, %arg5: memref<1x128xf32, #tpu.memory_space<vmem>>, %arg6: memref<128x128xbf16, #tpu.memory_space<vmem>>, %arg7: memref<1x128xf32, #tpu.memory_space<vmem>>, %arg8: memref<8x128xf32, #tpu.memory_space<vmem>>) attributes {dimension_semantics = [#tpu.dimension_semantics<parallel>], iteration_bounds = array<i64: 1>, scalar_prefetch = 0 : i64, scratch_operands = 0 : i64, tpu.core_type = #tpu.core_type<tc>, window_params = [{transform_indices = @transform_0, window_bounds = array<i64: 8, 32>}, {pipeline_mode = #tpu.pipeline_mode<synchronous>, transform_indices = @transform_1, window_bounds = array<i64: 32, 128>}, {pipeline_mode = #tpu.pipeline_mode<synchronous>, transform_indices = @transform_2, window_bounds = array<i64: 1, 128>}, {pipeline_mode = #tpu.pipeline_mode<synchronous>, transform_indices = @transform_3, window_bounds = array<i64: 128, 128>}, {pipeline_mode = #tpu.pipeline_mode<synchronous>, transform_indices = @transform_4, window_bounds = array<i64: 1, 128>}, {pipeline_mode = #tpu.pipeline_mode<synchronous>, transform_indices = @transform_5, window_bounds = array<i64: 128, 128>}, {pipeline_mode = #tpu.pipeline_mode<synchronous>, transform_indices = @transform_6, window_bounds = array<i64: 1, 128>}, {transform_indices = @transform_7, window_bounds = array<i64: 8, 128>}]} {
    %c0 = arith.constant 0 : index
    %c0_0 = arith.constant 0 : index
    %0 = vector.load %arg1[%c0, %c0_0] : memref<8x32xf32, #tpu.memory_space<vmem>>, vector<8x32xf32>
    %c0_1 = arith.constant 0 : index
    %c0_2 = arith.constant 0 : index
    %1 = vector.load %arg2[%c0_1, %c0_2] : memref<32x128xbf16, #tpu.memory_space<vmem>>, vector<32x128xbf16>
    %c0_3 = arith.constant 0 : index
    %c0_4 = arith.constant 0 : index
    %2 = vector.load %arg3[%c0_3, %c0_4] : memref<1x128xf32, #tpu.memory_space<vmem>>, vector<1x128xf32>
    %3 = arith.truncf %0 : vector<8x32xf32> to vector<8x32xbf16>
    %cst = arith.constant dense<0.000000e+00> : vector<8x128xf32>
    %4 = tpu.matmul %3, %1, %cst {dimension_numbers = #tpu.dot_dimension_numbers<[1], [0], [0], [1], [0, 0, 1, 1], [], []>} : vector<8x32xbf16>, vector<32x128xbf16>, vector<8x128xf32> -> vector<8x128xf32>
    %5 = vector.broadcast %2 : vector<1x128xf32> to vector<8x128xf32>
    %6 = arith.addf %4, %5 : vector<8x128xf32>
    %cst_5 = arith.constant 0.000000e+00 : f32
    %7 = vector.broadcast %cst_5 : f32 to vector<8x128xf32>
    %8 = arith.maximumf %6, %7 : vector<8x128xf32>
    %c0_6 = arith.constant 0 : index
    %c0_7 = arith.constant 0 : index
    %9 = vector.load %arg4[%c0_6, %c0_7] : memref<128x128xbf16, #tpu.memory_space<vmem>>, vector<128x128xbf16>
    %c0_8 = arith.constant 0 : index
    %c0_9 = arith.constant 0 : index
    %10 = vector.load %arg5[%c0_8, %c0_9] : memref<1x128xf32, #tpu.memory_space<vmem>>, vector<1x128xf32>
    %11 = arith.truncf %8 : vector<8x128xf32> to vector<8x128xbf16>
    %cst_10 = arith.constant dense<0.000000e+00> : vector<8x128xf32>
    %12 = tpu.matmul %11, %9, %cst_10 {dimension_numbers = #tpu.dot_dimension_numbers<[1], [0], [0], [1], [0, 0, 1, 1], [], []>} : vector<8x128xbf16>, vector<128x128xbf16>, vector<8x128xf32> -> vector<8x128xf32>
    %13 = vector.broadcast %10 : vector<1x128xf32> to vector<8x128xf32>
    %14 = arith.addf %12, %13 : vector<8x128xf32>
    %cst_11 = arith.constant 0.000000e+00 : f32
    %15 = vector.broadcast %cst_11 : f32 to vector<8x128xf32>
    %16 = arith.maximumf %14, %15 : vector<8x128xf32>
    %c0_12 = arith.constant 0 : index
    %c0_13 = arith.constant 0 : index
    %17 = vector.load %arg6[%c0_12, %c0_13] : memref<128x128xbf16, #tpu.memory_space<vmem>>, vector<128x128xbf16>
    %c0_14 = arith.constant 0 : index
    %c0_15 = arith.constant 0 : index
    %18 = vector.load %arg7[%c0_14, %c0_15] : memref<1x128xf32, #tpu.memory_space<vmem>>, vector<1x128xf32>
    %19 = arith.truncf %16 : vector<8x128xf32> to vector<8x128xbf16>
    %cst_16 = arith.constant dense<0.000000e+00> : vector<8x128xf32>
    %20 = tpu.matmul %19, %17, %cst_16 {dimension_numbers = #tpu.dot_dimension_numbers<[1], [0], [0], [1], [0, 0, 1, 1], [], []>} : vector<8x128xbf16>, vector<128x128xbf16>, vector<8x128xf32> -> vector<8x128xf32>
    %21 = vector.broadcast %18 : vector<1x128xf32> to vector<8x128xf32>
    %22 = arith.addf %20, %21 : vector<8x128xf32>
    %cst_17 = arith.constant 0.000000e+00 : f32
    %23 = vector.broadcast %cst_17 : f32 to vector<8x128xf32>
    %24 = arith.maximumf %22, %23 : vector<8x128xf32>
    %cst_18 = arith.constant 5.000000e-01 : f32
    %25 = vector.broadcast %cst_18 : f32 to vector<8x128xf32>
    %26 = arith.addf %24, %25 : vector<8x128xf32>
    %c0_19 = arith.constant 0 : index
    %c0_20 = arith.constant 0 : index
    %27 = vector.load %arg8[%c0_19, %c0_20] : memref<8x128xf32, #tpu.memory_space<vmem>>, vector<8x128xf32>
    tpu.vector_store %arg8[%c0_19, %c0_20], %26 {strides = array<i32>} : memref<8x128xf32, #tpu.memory_space<vmem>>, vector<8x128xf32>,
    return
  }
  func.func @transform_0(%arg0: i32) -> (i32, i32) {
    %c0_i32 = arith.constant 0 : i32
    %c0_i32_0 = arith.constant 0 : i32
    return %arg0, %c0_i32 : i32, i32
  }
  func.func @transform_1(%arg0: i32) -> (i32, i32) {
    %c0_i32 = arith.constant 0 : i32
    %c0_i32_0 = arith.constant 0 : i32
    %c0_i32_1 = arith.constant 0 : i32
    return %c0_i32, %c0_i32_0 : i32, i32
  }
  func.func @transform_2(%arg0: i32) -> (i32, i32) {
    %c0_i32 = arith.constant 0 : i32
    %c0_i32_0 = arith.constant 0 : i32
    %c0_i32_1 = arith.constant 0 : i32
    return %c0_i32, %c0_i32_0 : i32, i32
  }
  func.func @transform_3(%arg0: i32) -> (i32, i32) {
    %c0_i32 = arith.constant 0 : i32
    %c0_i32_0 = arith.constant 0 : i32
    %c0_i32_1 = arith.constant 0 : i32
    return %c0_i32, %c0_i32_0 : i32, i32
  }
  func.func @transform_4(%arg0: i32) -> (i32, i32) {
    %c0_i32 = arith.constant 0 : i32
    %c0_i32_0 = arith.constant 0 : i32
    %c0_i32_1 = arith.constant 0 : i32
    return %c0_i32, %c0_i32_0 : i32, i32
  }
  func.func @transform_5(%arg0: i32) -> (i32, i32) {
    %c0_i32 = arith.constant 0 : i32
    %c0_i32_0 = arith.constant 0 : i32
    %c0_i32_1 = arith.constant 0 : i32
    return %c0_i32, %c0_i32_0 : i32, i32
  }
  func.func @transform_6(%arg0: i32) -> (i32, i32) {
    %c0_i32 = arith.constant 0 : i32
    %c0_i32_0 = arith.constant 0 : i32
    %c0_i32_1 = arith.constant 0 : i32
    return %c0_i32, %c0_i32_0 : i32, i32
  }
  func.func @transform_7(%arg0: i32) -> (i32, i32) {
    %c0_i32 = arith.constant 0 : i32
    %c0_i32_0 = arith.constant 0 : i32
    return %arg0, %c0_i32 : i32, i32
  }
}

</mosaic_0001>

<bundles_post_ra>
// kernel: tpu_custom_call.1
= control target key start
LH: loop header
LB: loop body
LE: loop exit
PB: predicated region body
PF: predicated region fallthrough
CT: control target
= control target key end

     0   :  { %12 = vsyncpa [#allocation3], 0  ;;  %s616_s0 = inlined_call_operand.hbm [shape: f32[8,32], index: 0, kind: input, shape index: {}]   ;;  %s617_s1 = inlined_call_operand.hbm [shape: bf16[32,128], index: 1, kind: input, shape index: {}]   ;;  %s618_s2 = inlined_call_operand.vmem [shape: f32[1,128], index: 2, kind: input, shape index: {}]   ;;  %s619_s3 = inlined_call_operand.hbm [shape: bf16[128,128], index: 3, kind: input, shape index: {}]   ;;  %s620_s4 = inlined_call_operand.vmem [shape: f32[1,128], index: 4, kind: input, shape index: {}]   ;;  %s621_s5 = inlined_call_operand.hbm [shape: bf16[128,128], index: 5, kind: input, shape index: {}]   ;;  %s622_s6 = inlined_call_operand.vmem [shape: f32[1,128], index: 6, kind: input, shape index: {}]   ;;  %s623_s7 = inlined_call_operand.hbm [shape: f32[8,128], index: 7, kind: output, shape index: {}]  }
   0x1   :  { %13 = vsyncpa [#allocation6], 0 }
   0x2   :  { %14 = vsyncpa [#allocation9], 0  ;;  %s31_s26 = sshll.u32 %s617_s1, 4  ;;  %s32_s26 = int_to_ptr.hbm [resolvable:$true] %s31_s26 }
   0x3   :  { %15 = vsyncpa [#allocation4], 0  ;;  %s545_s27 = smov [#allocation5]   ;;  %s21_s8 = sshll.u32 %s616_s0, 4  ;;  %s22_s8 = int_to_ptr.hbm [resolvable:$true] %s21_s8 }
   0x4   :  { %s33_s28 = sshll.u32 %s545_s27, 4  ;;  %s546_s9 = smov 64   ;;  %s34_s28 = int_to_ptr.vmem [resolvable:$true] %s33_s28 }
   0x5   :  { %s547_s10 = smov 4   ;;  %s548_s11 = smov [#allocation2]  }
   0x6   :  { %39 = dma.hbm_to_vmem [thread:$0]  %s32_s26, 256, %s34_s28, [#allocation6], %s546_s9, %s546_s9, %s547_s10  }
   0x7   :  { %s23_s12 = sshll.u32 %s548_s11, 4  ;;  %s46_s15 = sshll.u32 %s619_s3, 4  ;;  %s24_s12 = int_to_ptr.vmem [resolvable:$true] %s23_s12  ;;  %s47_s15 = int_to_ptr.hbm [resolvable:$true] %s46_s15 }
   0x8   :  { %26 = dma.hbm_to_vmem [thread:$0]  %s22_s8, 128, %s24_s12, [#allocation3]  }
   0x9   :  { %s61_s17 = sshll.u32 %s621_s5, 4  ;;  %s549_s18 = smov [#allocation7]   ;;  %s62_s17 = int_to_ptr.hbm [resolvable:$true] %s61_s17 }
   0xa   :  { %s48_s19 = sshll.u32 %s549_s18, 4  ;;  %s550_s0 = smov [#allocation8]   ;;  %s49_s19 = int_to_ptr.vmem [resolvable:$true] %s48_s19 }
   0xb   :  { %54 = dma.hbm_to_vmem [thread:$0]  %s47_s15, 1024, %s49_s19, [#allocation6], %s546_s9, %s546_s9, %s547_s10  }
   0xc   :  { %s63_s20 = sshll.u32 %s550_s0, 4  ;;  %s64_s20 = int_to_ptr.vmem [resolvable:$true] %s63_s20 }
   0xd   :  { %69 = dma.hbm_to_vmem [thread:$0]  %s62_s17, 1024, %s64_s20, [#allocation9], %s546_s9, %s546_s9, %s547_s10  }
   0xe   :  { %537 = dma.done.wait [#allocation3], 128  }
   0xf   :  { %538 = vsyncadd [#allocation3], 4294967168 }
  0x10   :  { %539 = dma.done.wait [#allocation6], 1280  }
  0x11   :  { %540 = vsyncadd [#allocation6], 4294966016 }
  0x12   :  { %541 = dma.done.wait [#allocation9], 1024  }
  0x13   :  { %542 = vsyncadd [#allocation9], 4294966272  ;;  %v390_v0 = vld [vmem:[#allocation5 + $0x8] sm:$0xff]  ;;  %v389_v2 = vld [vmem:[#allocation5] sm:$0xff]  ;;  %vm111_vm0 = vcmask 261120   ;;  %s551_s24 = smov [#allocation10]  }
  0x14   :  { %v398_v1 = vld [vmem:[#allocation7 + $0x38] sm:$0xff]  ;;  %121 = vmatpush.bf16.msra.mxu0 %v390_v0  ;;  %v89_v3 = vld [vmem:[#allocation2] sm:$0xff]  ;;  %v397_v4 = vld [vmem:[#allocation7 + $0x30] sm:$0xff]  ;;  %s302_s25 = sshll.u32 %s551_s24, 4  ;;  %s304_s28 = sshll.u32 %s623_s7, 4  ;;  %s303_s25 = int_to_ptr.vmem [resolvable:$true] %s302_s25  ;;  %s305_s28 = int_to_ptr.hbm [resolvable:$true] %s304_s28 }
  0x15   :  { %198 = vmatpush.bf16.msra.mxu1 %v398_v1  ;;  %v95_v5 = vpack.c.bf16 %v89_v3, %v89_v3  ;;  %v396_v6 = vld [vmem:[#allocation7 + $0x28] sm:$0xff]  ;;  %v395_v7 = vld [vmem:[#allocation7 + $0x20] sm:$0xff]  ;;  %v394_v8 = vld [vmem:[#allocation7 + $0x18] sm:$0xff] }
  0x16   :  { %v393_v9 = vld [vmem:[#allocation7 + $0x10] sm:$0xff]  ;;  %v392_v10 = vld [vmem:[#allocation7 + $0x8] sm:$0xff]  ;;  %v391_v11 = vld [vmem:[#allocation7] sm:$0xff] }
  0x17   :  { %v406_v12 = vld [vmem:[#allocation8 + $0x38] sm:$0xff]  ;;  %v405_v13 = vld [vmem:[#allocation8 + $0x30] sm:$0xff]  ;;  %v404_v14 = vld [vmem:[#allocation8 + $0x28] sm:$0xff] }
  0x18   :  { %122 = vmatpush.bf16.msra.mxu0 %v389_v2  ;;  %281 = vmatpush.bf16.msra.mxu2 %v406_v12  ;;  %v403_v15 = vld [vmem:[#allocation8 + $0x20] sm:$0xff]  ;;  %v402_v16 = vld [vmem:[#allocation8 + $0x18] sm:$0xff]  ;;  %v401_v17 = vld [vmem:[#allocation8 + $0x10] sm:$0xff] }
  0x19   :  { %199 = vmatpush.bf16.msra.mxu1 %v397_v4  ;;  %v414_v18 = vld [vmem:[%s618_s2] ss:$0 sm:$0xff]  ;;  %v399_v25 = vld [vmem:[#allocation8] sm:$0xff] }
  0x1a   :  { %v400_v24 = vld [vmem:[#allocation8 + $0x8] sm:$0xff] }
  0x1b   :  { %324 = vmatmul.msk.bf16.vlgmr.msra.gmra.mxu0 %vm111_vm0, %v95_v5  ;;  %v415_v26 = vld [vmem:[%s620_s4] ss:$0 sm:$0xff] }
  0x1c   :  { %282 = vmatpush.bf16.msra.mxu2 %v405_v13  ;;  %v416_v32 = vld [vmem:[%s622_s6] ss:$0 sm:$0xff] }
  0x1d   :  { %200 = vmatpush.bf16.msra.mxu1 %v396_v6 }
  0x20   :  { %283 = vmatpush.bf16.msra.mxu2 %v404_v14 }
  0x21   :  { %201 = vmatpush.bf16.msra.mxu1 %v395_v7 }
  0x24   :  { %284 = vmatpush.bf16.msra.mxu2 %v403_v15 }
  0x25   :  { %202 = vmatpush.bf16.msra.mxu1 %v394_v8 }
  0x28   :  { %285 = vmatpush.bf16.msra.mxu2 %v402_v16 }
  0x29   :  { %203 = vmatpush.bf16.msra.mxu1 %v393_v9 }
  0x2c   :  { %286 = vmatpush.bf16.msra.mxu2 %v401_v17 }
  0x2d   :  { %204 = vmatpush.bf16.msra.mxu1 %v392_v10 }
  0x30   :  { %287 = vmatpush.bf16.msra.mxu2 %v400_v24 }
  0x31   :  { %205 = vmatpush.bf16.msra.mxu1 %v391_v11 }
  0x34   :  { %288 = vmatpush.bf16.msra.mxu2 %v399_v25 }
  0x98   :  { %v124_v19 = vpop.f32.mrf.mxu0 }
  0x99   :  { %v125_v20 = vadd.f32 %v414_v18, %v124_v19 }
  0x9b   :  { %v128_v21 = vmax.f32 %v125_v20, 0.0 }
  0x9d   :  { %v146_v22 = vpack.c.bf16 %v128_v21, %v128_v21 }
  0x9f   :  { %206 = vmatmul.bf16.vlgmr.msra.gmra.mxu1 %v146_v22 }
  0xa0   :  { %v126_v23 = vpop.f32.mrf.mxu0 }
 0x11c   :  { %v207_v27 = vpop.f32.mrf.mxu1 }
 0x11d   :  { %v208_v28 = vadd.f32 %v415_v26, %v207_v27 }
 0x11f   :  { %v211_v29 = vmax.f32 %v208_v28, 0.0 }
 0x121   :  { %v229_v30 = vpack.c.bf16 %v211_v29, %v211_v29 }
 0x123   :  { %289 = vmatmul.bf16.vlgmr.msra.gmra.mxu2 %v229_v30 }
 0x124   :  { %v209_v31 = vpop.f32.mrf.mxu1 }
 0x1a6   :  { %v290_v33 = vpop.f32.mrf.mxu2 }
 0x1a7   :  { %v291_v34 = vadd.f32 %v416_v32, %v290_v33 }
 0x1a9   :  { %v294_v35 = vmax.f32 %v291_v34, 0.0 }
 0x1ab   :  { %v295_v36 = vadd.f32 0.5, %v294_v35 }
 0x1ad   :  { %296 = vst [vmem:[#allocation10] sm:$0xff] %v295_v36 }
 0x1ae   :  { %v292_v37 = vpop.f32.mrf.mxu2  ;;  %307 = dma.vmem_to_hbm [thread:$0]  %s303_s25, 128, %s305_s28, [#allocation4]  }
 0x1af   :  { %543 = dma.done.wait [#allocation4], 128  }
 0x1b0   :  { %544 = vsyncadd [#allocation4], 4294967168 }
 0x1b1   :  { %312 = vsyncpa [#allocation3], 1 }
 0x1b2   :  { %313 = vsyncpa [#allocation6], 1 }
 0x1b3   :  { %314 = vsyncpa [#allocation9], 1 }
 0x1b4   :  { %315 = vsyncpa [#allocation4], 1 }

// kernel: tpu_custom_call.1
= control target key start
LH: loop header
LB: loop body
LE: loop exit
PB: predicated region body
PF: predicated region fallthrough
CT: control target
= control target key end

     0   :  { %12 = vsyncpa [#allocation3], 0  ;;  %s616_s0 = inlined_call_operand.hbm [shape: f32[8,32], index: 0, kind: input, shape index: {}]   ;;  %s617_s1 = inlined_call_operand.hbm [shape: bf16[32,128], index: 1, kind: input, shape index: {}]   ;;  %s618_s2 = inlined_call_operand.vmem [shape: f32[1,128], index: 2, kind: input, shape index: {}]   ;;  %s619_s3 = inlined_call_operand.hbm [shape: bf16[128,128], index: 3, kind: input, shape index: {}]   ;;  %s620_s4 = inlined_call_operand.vmem [shape: f32[1,128], index: 4, kind: input, shape index: {}]   ;;  %s621_s5 = inlined_call_operand.hbm [shape: bf16[128,128], index: 5, kind: input, shape index: {}]   ;;  %s622_s6 = inlined_call_operand.vmem [shape: f32[1,128], index: 6, kind: input, shape index: {}]   ;;  %s623_s7 = inlined_call_operand.hbm [shape: f32[8,128], index: 7, kind: output, shape index: {}]  }
   0x1   :  { %13 = vsyncpa [#allocation6], 0 }
   0x2   :  { %14 = vsyncpa [#allocation9], 0  ;;  %s31_s26 = sshll.u32 %s617_s1, 4  ;;  %s32_s26 = int_to_ptr.hbm [resolvable:$true] %s31_s26 }
   0x3   :  { %15 = vsyncpa [#allocation4], 0  ;;  %s545_s27 = smov [#allocation5]   ;;  %s21_s8 = sshll.u32 %s616_s0, 4  ;;  %s22_s8 = int_to_ptr.hbm [resolvable:$true] %s21_s8 }
   0x4   :  { %s33_s28 = sshll.u32 %s545_s27, 4  ;;  %s546_s9 = smov 64   ;;  %s34_s28 = int_to_ptr.vmem [resolvable:$true] %s33_s28 }
   0x5   :  { %s547_s10 = smov 4   ;;  %s548_s11 = smov [#allocation2]  }
   0x6   :  { %39 = dma.hbm_to_vmem [thread:$0]  %s32_s26, 256, %s34_s28, [#allocation6], %s546_s9, %s546_s9, %s547_s10  }
   0x7   :  { %s23_s12 = sshll.u32 %s548_s11, 4  ;;  %s46_s15 = sshll.u32 %s619_s3, 4  ;;  %s24_s12 = int_to_ptr.vmem [resolvable:$true] %s23_s12  ;;  %s47_s15 = int_to_ptr.hbm [resolvable:$true] %s46_s15 }
   0x8   :  { %26 = dma.hbm_to_vmem [thread:$0]  %s22_s8, 128, %s24_s12, [#allocation3]  }
   0x9   :  { %s61_s17 = sshll.u32 %s621_s5, 4  ;;  %s549_s18 = smov [#allocation7]   ;;  %s62_s17 = int_to_ptr.hbm [resolvable:$true] %s61_s17 }
   0xa   :  { %s48_s19 = sshll.u32 %s549_s18, 4  ;;  %s550_s0 = smov [#allocation8]   ;;  %s49_s19 = int_to_ptr.vmem [resolvable:$true] %s48_s19 }
   0xb   :  { %54 = dma.hbm_to_vmem [thread:$0]  %s47_s15, 1024, %s49_s19, [#allocation6], %s546_s9, %s546_s9, %s547_s10  }
   0xc   :  { %s63_s20 = sshll.u32 %s550_s0, 4  ;;  %s64_s20 = int_to_ptr.vmem [resolvable:$true] %s63_s20 }
   0xd   :  { %69 = dma.hbm_to_vmem [thread:$0]  %s62_s17, 1024, %s64_s20, [#allocation9], %s546_s9, %s546_s9, %s547_s10  }
   0xe   :  { %537 = dma.done.wait [#allocation3], 128  }
   0xf   :  { %538 = vsyncadd [#allocation3], 4294967168 }
  0x10   :  { %539 = dma.done.wait [#allocation6], 1280  }
  0x11   :  { %540 = vsyncadd [#allocation6], 4294966016 }
  0x12   :  { %541 = dma.done.wait [#allocation9], 1024  }
  0x13   :  { %542 = vsyncadd [#allocation9], 4294966272  ;;  %v390_v0 = vld [vmem:[#allocation5 + $0x8] sm:$0xff]  ;;  %v389_v2 = vld [vmem:[#allocation5] sm:$0xff]  ;;  %vm111_vm0 = vcmask 261120   ;;  %s551_s24 = smov [#allocation10]  }
  0x14   :  { %v398_v1 = vld [vmem:[#allocation7 + $0x38] sm:$0xff]  ;;  %121 = vmatpush.bf16.msra.mxu0 %v390_v0  ;;  %v89_v3 = vld [vmem:[#allocation2] sm:$0xff]  ;;  %v397_v4 = vld [vmem:[#allocation7 + $0x30] sm:$0xff]  ;;  %s302_s25 = sshll.u32 %s551_s24, 4  ;;  %s304_s28 = sshll.u32 %s623_s7, 4  ;;  %s303_s25 = int_to_ptr.vmem [resolvable:$true] %s302_s25  ;;  %s305_s28 = int_to_ptr.hbm [resolvable:$true] %s304_s28 }
  0x15   :  { %198 = vmatpush.bf16.msra.mxu1 %v398_v1  ;;  %v95_v5 = vpack.c.bf16 %v89_v3, %v89_v3  ;;  %v396_v6 = vld [vmem:[#allocation7 + $0x28] sm:$0xff]  ;;  %v395_v7 = vld [vmem:[#allocation7 + $0x20] sm:$0xff]  ;;  %v394_v8 = vld [vmem:[#allocation7 + $0x18] sm:$0xff] }
  0x16   :  { %v393_v9 = vld [vmem:[#allocation7 + $0x10] sm:$0xff]  ;;  %v392_v10 = vld [vmem:[#allocation7 + $0x8] sm:$0xff]  ;;  %v391_v11 = vld [vmem:[#allocation7] sm:$0xff] }
  0x17   :  { %v406_v12 = vld [vmem:[#allocation8 + $0x38] sm:$0xff]  ;;  %v405_v13 = vld [vmem:[#allocation8 + $0x30] sm:$0xff]  ;;  %v404_v14 = vld [vmem:[#allocation8 + $0x28] sm:$0xff] }
  0x18   :  { %122 = vmatpush.bf16.msra.mxu0 %v389_v2  ;;  %281 = vmatpush.bf16.msra.mxu2 %v406_v12  ;;  %v403_v15 = vld [vmem:[#allocation8 + $0x20] sm:$0xff]  ;;  %v402_v16 = vld [vmem:[#allocation8 + $0x18] sm:$0xff]  ;;  %v401_v17 = vld [vmem:[#allocation8 + $0x10] sm:$0xff] }
  0x19   :  { %199 = vmatpush.bf16.msra.mxu1 %v397_v4  ;;  %v414_v18 = vld [vmem:[%s618_s2] ss:$0 sm:$0xff]  ;;  %v399_v25 = vld [vmem:[#allocation8] sm:$0xff] }
  0x1a   :  { %v400_v24 = vld [vmem:[#allocation8 + $0x8] sm:$0xff] }
  0x1b   :  { %324 = vmatmul.msk.bf16.vlgmr.msra.gmra.mxu0 %vm111_vm0, %v95_v5  ;;  %v415_v26 = vld [vmem:[%s620_s4] ss:$0 sm:$0xff] }
  0x1c   :  { %282 = vmatpush.bf16.msra.mxu2 %v405_v13  ;;  %v416_v32 = vld [vmem:[%s622_s6] ss:$0 sm:$0xff] }
  0x1d   :  { %200 = vmatpush.bf16.msra.mxu1 %v396_v6 }
  0x20   :  { %283 = vmatpush.bf16.msra.mxu2 %v404_v14 }
  0x21   :  { %201 = vmatpush.bf16.msra.mxu1 %v395_v7 }
  0x24   :  { %284 = vmatpush.bf16.msra.mxu2 %v403_v15 }
  0x25   :  { %202 = vmatpush.bf16.msra.mxu1 %v394_v8 }
  0x28   :  { %285 = vmatpush.bf16.msra.mxu2 %v402_v16 }
  0x29   :  { %203 = vmatpush.bf16.msra.mxu1 %v393_v9 }
  0x2c   :  { %286 = vmatpush.bf16.msra.mxu2 %v401_v17 }
  0x2d   :  { %204 = vmatpush.bf16.msra.mxu1 %v392_v10 }
  0x30   :  { %287 = vmatpush.bf16.msra.mxu2 %v400_v24 }
  0x31   :  { %205 = vmatpush.bf16.msra.mxu1 %v391_v11 }
  0x34   :  { %288 = vmatpush.bf16.msra.mxu2 %v399_v25 }
  0x98   :  { %v124_v19 = vpop.f32.mrf.mxu0 }
  0x99   :  { %v125_v20 = vadd.f32 %v414_v18, %v124_v19 }
  0x9b   :  { %v128_v21 = vmax.f32 %v125_v20, 0.0 }
  0x9d   :  { %v146_v22 = vpack.c.bf16 %v128_v21, %v128_v21 }
  0x9f   :  { %206 = vmatmul.bf16.vlgmr.msra.gmra.mxu1 %v146_v22 }
  0xa0   :  { %v126_v23 = vpop.f32.mrf.mxu0 }
 0x11c   :  { %v207_v27 = vpop.f32.mrf.mxu1 }
 0x11d   :  { %v208_v28 = vadd.f32 %v415_v26, %v207_v27 }
 0x11f   :  { %v211_v29 = vmax.f32 %v208_v28, 0.0 }
 0x121   :  { %v229_v30 = vpack.c.bf16 %v211_v29, %v211_v29 }
 0x123   :  { %289 = vmatmul.bf16.vlgmr.msra.gmra.mxu2 %v229_v30 }
 0x124   :  { %v209_v31 = vpop.f32.mrf.mxu1 }
 0x1a6   :  { %v290_v33 = vpop.f32.mrf.mxu2 }
 0x1a7   :  { %v291_v34 = vadd.f32 %v416_v32, %v290_v33 }
 0x1a9   :  { %v294_v35 = vmax.f32 %v291_v34, 0.0 }
 0x1ab   :  { %v295_v36 = vadd.f32 0.5, %v294_v35 }
 0x1ad   :  { %296 = vst [vmem:[#allocation10] sm:$0xff] %v295_v36 }
 0x1ae   :  { %v292_v37 = vpop.f32.mrf.mxu2  ;;  %307 = dma.vmem_to_hbm [thread:$0]  %s303_s25, 128, %s305_s28, [#allocation4]  }
 0x1af   :  { %543 = dma.done.wait [#allocation4], 128  }
 0x1b0   :  { %544 = vsyncadd [#allocation4], 4294967168 }
 0x1b1   :  { %312 = vsyncpa [#allocation3], 1 }
 0x1b2   :  { %313 = vsyncpa [#allocation6], 1 }
 0x1b3   :  { %314 = vsyncpa [#allocation9], 1 }
 0x1b4   :  { %315 = vsyncpa [#allocation4], 1 }

</bundles_post_ra>
